<compile_context>
chip_gen: v7x
topology: tpu7x:2x2x1
jax: 0.10.0
libtpu: 0.0.40
codegen_flags: <defaults>
</compile_context>

<pallas_src>
import functools

import jax
import jax.numpy as jnp
from jax.experimental import pallas as pl
from jax.experimental.pallas import tpu as pltpu


def _round_up(x, m):
    return ((x + m - 1) // m) * m


def _tpu_generation():
    try:
        kind = jax.devices()[0].device_kind.lower()
    except Exception:
        return "unknown"
    if "v7" in kind:
        return "v7x"
    if "v6" in kind:
        return "v6e"
    if "v5e" in kind or "v5 lite" in kind or "v5lite" in kind:
        return "v5e"
    return "unknown"


# Per-generation default (tm, tn, tk).
#   v6e: needs ~680 flops/byte to be MXU-bound -> 1024x1024 output tiles.
#   v7x: HBM is ~3.2 TB/s (roofline ~310 flops/byte) and VMEM is only 64 MiB/TC
#        -> 512x512 already saturates it; keep the footprint small.
#   v5e: roofline ~240 flops/byte -> 512x512 is enough.
_TILE_TABLE = {
    "v6e": (1024, 1024, 1024),
    "v7x": (512, 512, 1024),
    "v5e": (512, 512, 1024),
    "unknown": (512, 512, 1024),
}

# Scoped-VMEM cap we are willing to request per generation (physical: 128/128/64 MiB).
_VMEM_CAP = {
    "v6e": 100 * 1024 * 1024,
    "v5e": 100 * 1024 * 1024,
    "v7x": 56 * 1024 * 1024,
    "unknown": 56 * 1024 * 1024,
}


def _pick_tiles(n_out, k_in, gen=None):
    gen = gen or _tpu_generation()
    tm, tn, tk = _TILE_TABLE.get(gen, _TILE_TABLE["unknown"])
    # Clamp to (hardware-aligned) problem dims so small layers don't over-pad.
    tn = min(tn, _round_up(n_out, 128))
    tk = min(tk, _round_up(k_in, 128))
    return tm, tn, tk


def _prepare_operands(int8_weights, scales, bias, tn, tk):
    """Transpose int8 weights to [K, N] and pad weights/scales/bias to tile multiples.

    Done once at layer init (hoisted out of the per-call path).
    """
    n_out, k_in = int8_weights.shape
    Np, Kp = _round_up(n_out, tn), _round_up(k_in, tk)
    w_kn = jnp.asarray(int8_weights).T  # [K, N], lane-dense on N for the MXU RHS
    if (Kp, Np) != (k_in, n_out):
        w_kn = jnp.pad(w_kn, ((0, Kp - k_in), (0, Np - n_out)))
    scales_p = jnp.pad(jnp.asarray(scales, jnp.float32).reshape(1, n_out),
                       ((0, 0), (0, Np - n_out)))
    if bias is None:
        bias_p = jnp.zeros((1, Np), jnp.float32)
    else:
        bias_p = jnp.pad(jnp.asarray(bias, jnp.float32).reshape(1, n_out),
                         ((0, 0), (0, Np - n_out)))
    return w_kn, scales_p, bias_p


def _w8a16_kernel(x_ref, w_ref, scales_ref, bias_ref, o_ref, acc_ref, *, mxu_bf16):
    # x_ref:      [tm, tk] activations (f32 or bf16)
    # w_ref:      [tk, tn] int8 weight tile (pre-transposed [K, N] layout)
    # scales_ref: [1,  tn] f32 per-output-channel scales
    # bias_ref:   [1,  tn] f32 bias
    # o_ref:      [tm, tn] output tile
    # acc_ref:    [tm, tn] f32 accumulator scratch (resident across the K axis)
    k = pl.program_id(2)

    @pl.when(k == 0)
    def _():
        acc_ref[...] = jnp.zeros_like(acc_ref)

    x = x_ref[...]
    if mxu_bf16 and x.dtype == jnp.float32:
        # bf16 MXU operands: ~3-4x matmul throughput; int8 -> bf16 weight cast is
        # exact, only the f32 activation mantissa is truncated (opt-in).
        x = x.astype(jnp.bfloat16)
    w = w_ref[...].astype(x.dtype)  # per-tile int8 -> activation dtype cast
    acc_ref[...] += jnp.dot(x, w, preferred_element_type=jnp.float32)

    @pl.when(k == pl.num_programs(2) - 1)
    def _():
        out = acc_ref[...] * scales_ref[...] + bias_ref[...]
        o_ref[...] = out.astype(o_ref.dtype)


@functools.partial(jax.jit,
                   static_argnames=("n_out", "tm", "tn", "tk", "mxu_bf16"))
def _w8a16_gemm(x, w_kn_p, scales_p, bias_p, *, n_out, tm, tn, tk, mxu_bf16):
    """out[..., n] = sum_k x[..., k] * W[n, k] * scales[n] + bias[n]

    x:        [..., K]  activations (f32 or bf16)
    w_kn_p:   [Kp, Np]  int8 weights, pre-transposed & padded
    scales_p: [1,  Np]  f32
    bias_p:   [1,  Np]  f32
    """
    lead_shape = x.shape[:-1]
    K = x.shape[-1]
    x2d = x.reshape(-1, K)
    M = x2d.shape[0]
    Kp, Np = w_kn_p.shape

    # tm rounded to the activation dtype's sublane packing (16 for bf16, 8 for f32).
    min_tm = 16 if x.dtype == jnp.bfloat16 else 8
    tm = min(tm, _round_up(M, min_tm))
    Mp = _round_up(M, tm)

    gen = _tpu_generation()
    # v7x has 2 TensorCores sharded over "parallel" grid axes: make sure at least
    # one parallel axis has >= 2 blocks for decode-style (small-M) shapes.
    if gen == "v7x" and Mp // tm < 2 and Np // tn < 2 and tn % 256 == 0:
        tn = tn // 2  # still a multiple of 128 and still divides Np

    x_p = x2d if (Mp, Kp) == (M, K) else jnp.pad(x2d, ((0, Mp - M), (0, Kp - K)))

    grid = (Mp // tm, Np // tn, Kp // tk)

    x_size = x.dtype.itemsize
    o_size = x.dtype.itemsize
    # Double-buffered tile footprint + 30% headroom, capped per generation.
    vmem_bytes = int(1.3 * (
        2 * (tm * tk * x_size)       # activation tiles
        + 2 * (tk * tn)              # int8 weight tiles
        + 2 * (tm * tn * o_size)     # output tiles
        + 2 * (2 * tn * 4)           # scales + bias tiles
        + tm * tn * 4                # f32 accumulator scratch
    ))
    vmem_bytes = max(16 * 1024 * 1024, min(vmem_bytes, _VMEM_CAP[gen]))

    out = pl.pallas_call(
        functools.partial(_w8a16_kernel, mxu_bf16=mxu_bf16),
        out_shape=jax.ShapeDtypeStruct((Mp, Np), x.dtype),
        grid_spec=pltpu.PrefetchScalarGridSpec(
            num_scalar_prefetch=0,
            grid=grid,
            in_specs=[
                # activation tile: varies with (i, k)
                pl.BlockSpec((tm, tk), lambda i, j, k: (i, k)),
                # int8 weight tile in pre-transposed [K, N] layout: varies with (k, j)
                pl.BlockSpec((tk, tn), lambda i, j, k: (k, j)),
                # per-output-channel scales / bias: vary with j only
                pl.BlockSpec((1, tn), lambda i, j, k: (0, j)),
                pl.BlockSpec((1, tn), lambda i, j, k: (0, j)),
            ],
            out_specs=pl.BlockSpec((tm, tn), lambda i, j, k: (i, j)),
            scratch_shapes=[pltpu.VMEM((tm, tn), jnp.float32)],
        ),
        compiler_params=pltpu.CompilerParams(
            dimension_semantics=("parallel", "parallel", "arbitrary"),
            vmem_limit_bytes=vmem_bytes,
        ),
        cost_estimate=pl.CostEstimate(
            flops=2 * Mp * Np * Kp,
            transcendentals=0,
            bytes_accessed=(
                Mp * Kp * x_size * (Np // tn)   # activations re-read per N block
                + Kp * Np * (Mp // tm)          # int8 weights re-read per M block
                + Mp * Np * o_size              # output written once
            ),
        ),
    )(x_p, w_kn_p, scales_p, bias_p)

    out = out[:M, :n_out]
    return out.reshape(*lead_shape, n_out)


def w8_a16_forward(int8_weights, x, scales, bias=None, *, mxu_bf16=False):
    """Standalone Pallas equivalent of the PyTorch w8_a16_forward.

    int8_weights: [out_features, in_features] int8
    x:            [..., in_features] float32 or bfloat16
    scales:       [out_features]
    bias:         [1, out_features] or None
    returns       [..., out_features] in x.dtype

    Note: this preps (transposes/pads) the weights per call; W8A16LinearLayer
    caches the prepped buffers at init and should be preferred.
    """
    n_out, k_in = int8_weights.shape
    tm, tn, tk = _pick_tiles(n_out, k_in)
    w_kn_p, scales_p, bias_p = _prepare_operands(int8_weights, scales, bias, tn, tk)
    return _w8a16_gemm(x, w_kn_p, scales_p, bias_p, n_out=n_out,
                       tm=tm, tn=tn, tk=tk, mxu_bf16=mxu_bf16)


class W8A16LinearLayer:
    """JAX/Pallas port of the PyTorch W8A16LinearLayer (deterministic init).

    Weight transpose/padding is done once at init (hoisted off the forward path).
    Set mxu_bf16=True to run the MXU in bf16 even for f32 activations (faster,
    truncates activation mantissa).
    """

    def __init__(self, in_features, out_features, bias=True, dtype=jnp.float32,
                 key=None, mxu_bf16=False):
        if key is None:
            key = jax.random.PRNGKey(0)
        k_w, k_s, k_b = jax.random.split(key, 3)
        self.int8_weights = jax.random.randint(
            k_w, (out_features, in_features), -128, 127, dtype=jnp.int8)
        self.scales = jax.random.normal(k_s, (out_features,), dtype=dtype)
        self.bias = (jax.random.normal(k_b, (1, out_features), dtype=dtype)
                     if bias else None)
        self.mxu_bf16 = mxu_bf16
        self._gen = _tpu_generation()
        self._tm, self._tn, self._tk = _pick_tiles(out_features, in_features,
                                                   self._gen)
        self._w_kn_p, self._scales_p, self._bias_p = _prepare_operands(
            self.int8_weights, self.scales, self.bias, self._tn, self._tk)

    def quantize(self, weights):
        w_fp32 = jnp.asarray(weights, jnp.float32)
        scales = jnp.max(jnp.abs(w_fp32), axis=-1) / 127.0
        self.int8_weights = jnp.round(w_fp32 / scales[:, None]).astype(jnp.int8)
        self.scales = scales.astype(jnp.asarray(weights).dtype)
        self._w_kn_p, self._scales_p, self._bias_p = _prepare_operands(
            self.int8_weights, self.scales, self.bias, self._tn, self._tk)

    def __call__(self, x):
        return _w8a16_gemm(x, self._w_kn_p, self._scales_p, self._bias_p,
                           n_out=self.scales.shape[0],
                           tm=self._tm, tn=self._tn, tk=self._tk,
                           mxu_bf16=self.mxu_bf16)


if __name__ == "__main__":
    key = jax.random.PRNGKey(0)
    k_l1, k_x1, k_l2, k_x2, k_l3, k_x3 = jax.random.split(key, 6)

    # --- case 1: small aligned-ish shapes, f32 activations (bit-exact path) ---
    batch, seq, in_features, out_features = 2, 8, 32, 64
    layer = W8A16LinearLayer(in_features, out_features, bias=True, key=k_l1)
    x = jax.random.normal(k_x1, (batch, seq, in_features), dtype=jnp.float32)

    out = jax.block_until_ready(layer(x))
    ref = (x @ layer.int8_weights.astype(x.dtype).T) * layer.scales + layer.bias
    assert out.shape == (batch, seq, out_features)
    assert jnp.allclose(out, ref, atol=1e-4, rtol=1e-4), "mismatch vs ref (case 1)"

    # --- case 2: ragged shapes exercising the pad/crop path ---
    b2, s2, in2, out2 = 3, 7, 48, 100
    layer2 = W8A16LinearLayer(in2, out2, bias=True, key=k_l2)
    x2 = jax.random.normal(k_x2, (b2, s2, in2), dtype=jnp.float32)

    out2_v = jax.block_until_ready(layer2(x2))
    ref2 = (x2 @ layer2.int8_weights.astype(x2.dtype).T) * layer2.scales + layer2.bias
    assert out2_v.shape == (b2, s2, out2)
    assert jnp.allclose(out2_v, ref2, atol=1e-4, rtol=1e-4), "mismatch vs ref (case 2)"

    # --- case 3: bf16 activations ("A16" path) via the standalone forward ---
    b3, s3, in3, out3 = 2, 8, 32, 64
    layer3 = W8A16LinearLayer(in3, out3, bias=True, key=k_l3)
    x3 = jax.random.normal(k_x3, (b3, s3, in3), dtype=jnp.float32).astype(jnp.bfloat16)

    out3_v = jax.block_until_ready(
        w8_a16_forward(layer3.int8_weights, x3, layer3.scales, layer3.bias))
    ref3 = ((x3.astype(jnp.float32) @ layer3.int8_weights.astype(jnp.float32).T)
            * layer3.scales.astype(jnp.float32) + layer3.bias.astype(jnp.float32))
    rel_err = (jnp.max(jnp.abs(out3_v.astype(jnp.float32) - ref3))
               / (jnp.max(jnp.abs(ref3)) + 1e-6))
    assert out3_v.dtype == jnp.bfloat16 and out3_v.shape == (b3, s3, out3)
    assert rel_err < 2e-2, f"mismatch vs ref (case 3), rel_err={rel_err}"

    # --- case 4: f32 activations with opt-in bf16 MXU operands (fast path) ---
    out4_v = jax.block_until_ready(
        w8_a16_forward(layer.int8_weights, x, layer.scales, layer.bias,
                       mxu_bf16=True))
    rel_err4 = (jnp.max(jnp.abs(out4_v - ref)) / (jnp.max(jnp.abs(ref)) + 1e-6))
    assert rel_err4 < 2e-2, f"mismatch vs ref (case 4), rel_err={rel_err4}"

    print("KERNEL_OK")
</pallas_src>

<mosaic_0001>
module attributes {stable_mosaic.version = 11 : i64} {
  func.func @_w8a16_kernel(%arg0: i32, %arg1: i32, %arg2: i32, %arg3: memref<16x128xf32, #tpu.memory_space<vmem>>, %arg4: memref<128x128xi8, #tpu.memory_space<vmem>>, %arg5: memref<1x128xf32, #tpu.memory_space<vmem>>, %arg6: memref<1x128xf32, #tpu.memory_space<vmem>>, %arg7: memref<16x128xf32, #tpu.memory_space<vmem>>, %arg8: memref<16x128xf32, #tpu.memory_space<vmem>>) attributes {dimension_semantics = [#tpu.dimension_semantics<parallel>, #tpu.dimension_semantics<parallel>, #tpu.dimension_semantics<arbitrary>], iteration_bounds = array<i64: 1, 1, 1>, scalar_prefetch = 0 : i64, scratch_operands = 1 : i64, tpu.core_type = #tpu.core_type<tc>, window_params = [{transform_indices = @transform_0, window_bounds = array<i64: 16, 128>}, {transform_indices = @transform_1, window_bounds = array<i64: 128, 128>}, {transform_indices = @transform_2, window_bounds = array<i64: 1, 128>}, {transform_indices = @transform_3, window_bounds = array<i64: 1, 128>}, {transform_indices = @transform_4, window_bounds = array<i64: 16, 128>}]} {
    %c0_i32 = arith.constant 0 : i32
    %0 = arith.cmpi eq, %arg2, %c0_i32 : i32
    %1 = arith.extui %0 : i1 to i32
    %c0_i32_0 = arith.constant 0 : i32
    %2 = arith.cmpi ne, %1, %c0_i32_0 : i32
    scf.if %2 {
      %cst_10 = arith.constant 0.000000e+00 : f32
      %13 = vector.broadcast %cst_10 : f32 to vector<16x128xf32>
      %c0_11 = arith.constant 0 : index
      %c0_12 = arith.constant 0 : index
      %14 = vector.load %arg8[%c0_11, %c0_12] : memref<16x128xf32, #tpu.memory_space<vmem>>, vector<16x128xf32>
      tpu.vector_store %arg8[%c0_11, %c0_12], %13 {strides = array<i32>} : memref<16x128xf32, #tpu.memory_space<vmem>>, vector<16x128xf32>,
    } else {
    }
    %c0 = arith.constant 0 : index
    %c0_1 = arith.constant 0 : index
    %3 = vector.load %arg3[%c0, %c0_1] : memref<16x128xf32, #tpu.memory_space<vmem>>, vector<16x128xf32>
    %c0_2 = arith.constant 0 : index
    %c0_3 = arith.constant 0 : index
    %4 = vector.load %arg4[%c0_2, %c0_3] : memref<128x128xi8, #tpu.memory_space<vmem>>, vector<128x128xi8>
    %5 = arith.sitofp %4 : vector<128x128xi8> to vector<128x128xf32>
    %c0_4 = arith.constant 0 : index
    %c0_5 = arith.constant 0 : index
    %6 = vector.load %arg8[%c0_4, %c0_5] : memref<16x128xf32, #tpu.memory_space<vmem>>, vector<16x128xf32>
    %cst = arith.constant dense<0.000000e+00> : vector<16x128xf32>
    %7 = tpu.matmul %3, %5, %cst {dimension_numbers = #tpu.dot_dimension_numbers<[1], [0], [0], [1], [0, 0, 1, 1], [], []>} : vector<16x128xf32>, vector<128x128xf32>, vector<16x128xf32> -> vector<16x128xf32>
    %8 = arith.addf %6, %7 : vector<16x128xf32>
    %c0_6 = arith.constant 0 : index
    %c0_7 = arith.constant 0 : index
    %9 = vector.load %arg8[%c0_6, %c0_7] : memref<16x128xf32, #tpu.memory_space<vmem>>, vector<16x128xf32>
    tpu.vector_store %arg8[%c0_6, %c0_7], %8 {strides = array<i32>} : memref<16x128xf32, #tpu.memory_space<vmem>>, vector<16x128xf32>,
    %c0_i32_8 = arith.constant 0 : i32
    %10 = arith.cmpi eq, %arg2, %c0_i32_8 : i32
    %11 = arith.extui %10 : i1 to i32
    %c0_i32_9 = arith.constant 0 : i32
    %12 = arith.cmpi ne, %11, %c0_i32_9 : i32
    scf.if %12 {
      %c0_10 = arith.constant 0 : index
      %c0_11 = arith.constant 0 : index
      %13 = vector.load %arg8[%c0_10, %c0_11] : memref<16x128xf32, #tpu.memory_space<vmem>>, vector<16x128xf32>
      %c0_12 = arith.constant 0 : index
      %c0_13 = arith.constant 0 : index
      %14 = vector.load %arg5[%c0_12, %c0_13] : memref<1x128xf32, #tpu.memory_space<vmem>>, vector<1x128xf32>
      %15 = vector.broadcast %14 : vector<1x128xf32> to vector<16x128xf32>
      %16 = arith.mulf %13, %15 : vector<16x128xf32>
      %c0_14 = arith.constant 0 : index
      %c0_15 = arith.constant 0 : index
      %17 = vector.load %arg6[%c0_14, %c0_15] : memref<1x128xf32, #tpu.memory_space<vmem>>, vector<1x128xf32>
      %18 = vector.broadcast %17 : vector<1x128xf32> to vector<16x128xf32>
      %19 = arith.addf %16, %18 : vector<16x128xf32>
      %c0_16 = arith.constant 0 : index
      %c0_17 = arith.constant 0 : index
      %20 = vector.load %arg7[%c0_16, %c0_17] : memref<16x128xf32, #tpu.memory_space<vmem>>, vector<16x128xf32>
      tpu.vector_store %arg7[%c0_16, %c0_17], %19 {strides = array<i32>} : memref<16x128xf32, #tpu.memory_space<vmem>>, vector<16x128xf32>,
    } else {
    }
    return
  }
  func.func @transform_0(%arg0: i32, %arg1: i32, %arg2: i32) -> (i32, i32) {
    %c0_i32 = arith.constant 0 : i32
    return %arg0, %arg2 : i32, i32
  }
  func.func @transform_1(%arg0: i32, %arg1: i32, %arg2: i32) -> (i32, i32) {
    %c0_i32 = arith.constant 0 : i32
    return %arg2, %arg1 : i32, i32
  }
  func.func @transform_2(%arg0: i32, %arg1: i32, %arg2: i32) -> (i32, i32) {
    %c0_i32 = arith.constant 0 : i32
    %c0_i32_0 = arith.constant 0 : i32
    return %c0_i32, %arg1 : i32, i32
  }
  func.func @transform_3(%arg0: i32, %arg1: i32, %arg2: i32) -> (i32, i32) {
    %c0_i32 = arith.constant 0 : i32
    %c0_i32_0 = arith.constant 0 : i32
    return %c0_i32, %arg1 : i32, i32
  }
  func.func @transform_4(%arg0: i32, %arg1: i32, %arg2: i32) -> (i32, i32) {
    %c0_i32 = arith.constant 0 : i32
    return %arg0, %arg1 : i32, i32
  }
}

</mosaic_0001>

<bundles_post_ra>
// kernel: _w8a16_gemm.1
= control target key start
LH: loop header
LB: loop body
LE: loop exit
PB: predicated region body
PF: predicated region fallthrough
CT: control target
= control target key end

     0   :  { %s313_s1 = inlined_call_operand.vmem [shape: s8[128,128], index: 1, kind: input, shape index: {}]   ;;  %s314_s0 = inlined_call_operand.vmem [shape: f32[16,128], index: 0, kind: input, shape index: {}]   ;;  %s315_s2 = inlined_call_operand.vmem [shape: f32[1,128], index: 2, kind: input, shape index: {}]   ;;  %s316_s3 = inlined_call_operand.vmem [shape: f32[1,128], index: 3, kind: input, shape index: {}]   ;;  %s317_s4 = inlined_call_operand.vmem [shape: f32[16,128], index: 4, kind: output, shape index: {}]  }
   0x1   :  { %v25_v0 = vld [vmem:[%s313_s1] sm:$0xff]  ;;  %v26_v4 = vld [vmem:[%s313_s1 + $0x8] sm:$0xff]  ;;  %v27_v7 = vld [vmem:[%s313_s1 + $0x10] sm:$0xff] }
   0x2   :  { %v226_v1 = vunpack.c.l.s8.bf16 %v25_v0  ;;  %v230_v2 = vunpack.c.h.s8.bf16 %v25_v0  ;;  %v23_v3 = vld [vmem:[%s314_s0] sm:$0xff]  ;;  %v234_v5 = vunpack.c.l.s8.bf16 %v26_v4  ;;  %v238_v6 = vunpack.c.h.s8.bf16 %v26_v4  ;;  %v28_v10 = vld [vmem:[%s313_s1 + $0x18] sm:$0xff]  ;;  %v24_v13 = vld [vmem:[%s314_s0 + $0x8] sm:$0xff] }
   0x3   :  { %223 = vmatprep.mubr.f32.mxu0 %v23_v3  ;;  %v242_v8 = vunpack.c.l.s8.bf16 %v27_v7  ;;  %v246_v9 = vunpack.c.h.s8.bf16 %v27_v7  ;;  %v250_v11 = vunpack.c.l.s8.bf16 %v28_v10  ;;  %v254_v12 = vunpack.c.h.s8.bf16 %v28_v10  ;;  %v171_v14 = vld [vmem:[%s315_s2] ss:$0 sm:$0xff] }
   0x4   :  { %227 = vmatprep.subr.bf16.mxu0 %v226_v1  ;;  %v172_v16 = vld [vmem:[%s316_s3] ss:$0 sm:$0xff] }
   0x5   :  { %229 = vmatpush3.bf16.msra.mxu0 %v226_v1 }
   0x6   :  { %231 = vmatprep.subr.bf16.mxu0 %v230_v2 }
   0x9   :  { %233 = vmatpush3.bf16.msra.mxu0 %v230_v2 }
   0xa   :  { %235 = vmatprep.subr.bf16.mxu0 %v234_v5 }
   0xd   :  { %237 = vmatpush3.bf16.msra.mxu0 %v234_v5 }
   0xe   :  { %239 = vmatprep.subr.bf16.mxu0 %v238_v6 }
  0x11   :  { %241 = vmatpush3.bf16.msra.mxu0 %v238_v6 }
  0x12   :  { %243 = vmatprep.subr.bf16.mxu0 %v242_v8 }
  0x15   :  { %245 = vmatpush3.bf16.msra.mxu0 %v242_v8 }
  0x16   :  { %247 = vmatprep.subr.bf16.mxu0 %v246_v9 }
  0x19   :  { %249 = vmatpush3.bf16.msra.mxu0 %v246_v9 }
  0x1a   :  { %251 = vmatprep.subr.bf16.mxu0 %v250_v11 }
  0x1d   :  { %253 = vmatpush3.bf16.msra.mxu0 %v250_v11 }
  0x1e   :  { %255 = vmatprep.subr.bf16.mxu0 %v254_v12 }
  0x21   :  { %257 = vmatpush3.bf16.msra.mxu0 %v254_v12 }
  0x24   :  { %224 = vmatmul.mubr.f32.vlgmr.msra.gmra.mrb[0].mxu0 %v24_v13 }
  0xf7   :  { %v225_v15 = vpop.f32.mrb[0].mxu0 }
  0xf8   :  { %v155_v17 = vmul.f32 %v225_v15, %v171_v14  ;;  %v129_v18 = vpop.f32.mrb[1].mxu0 }
  0xf9   :  { %v154_v19 = vmul.f32 %v171_v14, %v129_v18 }
  0xfa   :  { %v164_v20 = vadd.f32 %v172_v16, %v155_v17 }
  0xfb   :  { %v163_v21 = vadd.f32 %v172_v16, %v154_v19 }
  0xfc   :  { %166 = vst [vmem:[%s317_s4 + $0x8] sm:$0xff] %v164_v20 }
  0xfd   :  { %165 = vst [vmem:[%s317_s4] sm:$0xff] %v163_v21 }

</bundles_post_ra>
